<compile_context>
chip_gen: v7x
topology: tpu7x:2x2x1
jax: 0.10.0
libtpu: 0.0.40
codegen_flags: <defaults>
</compile_context>

<pallas_src>
import jax
import jax.numpy as jnp
from jax.experimental import pallas as pl
from jax.experimental.pallas import tpu as pltpu

N_BATCH = 2
C_IN = 128
H, W = 5, 6
HW = H * W
C_POL = 32            # policy-head conv channels
C_VAL = 3             # value-head conv channels
C_TOT = C_POL + C_VAL # merged conv output width (35)
FC1_OUT = 32          # value-head fc1 width
N_MOVES = 7           # policy logits
PQ = N_MOVES * HW     # policy stripe width (210)
EPS = 1e-5

_VMEM = pl.BlockSpec(memory_space=pltpu.MemorySpace.VMEM)


# ----------------------------------------------------------------------------
# Fused kernel: merged 1x1 convs + folded BN + ReLU, value fc1/fc2/tanh,
#               policy fc + softmax -- one launch, everything stays on-chip.
# ----------------------------------------------------------------------------
def outblock_kernel(x_ref, wcat_ref, packed_ref, wf_ref, mask_ref,
                    r_ref, cpol_ref, w1slab_ref, out_ref):
    # ---- merged 1x1 convs (both heads); BN scale folded into wcat columns,
    # ---- conv bias + BN shift folded into packed row 0; epilogue = add+ReLU.
    y = jnp.dot(x_ref[...], wcat_ref[...],
                preferred_element_type=jnp.float32)                     # [N*HW, 35]
    y = jnp.maximum(y + packed_ref[0:1, :C_TOT], 0.0)

    r = r_ref[...]                                                      # [N, N*HW]

    # ---- value head: 3 per-channel broadcast FMAs + tiny reduce matmul -----
    #   pre[m, j] = sum_c y[m, 32+c] * fc1_w[j, c*HW + (m % HW)]
    pre = (y[:, C_POL + 0:C_POL + 1] * w1slab_ref[0]
           + y[:, C_POL + 1:C_POL + 2] * w1slab_ref[1]
           + y[:, C_POL + 2:C_POL + 3] * w1slab_ref[2])                 # [N*HW, 32]
    h = jnp.dot(r, pre, preferred_element_type=jnp.float32) \
        + packed_ref[1:2, :FC1_OUT]                                     # [N, 32]
    h = jnp.maximum(h, 0.0)
    # fc2 as VPU multiply + lane reduce (no 1-lane-wide MXU output)
    v = jnp.tanh(jnp.sum(h * packed_ref[3:4, :FC1_OUT], axis=-1, keepdims=True)
                 + packed_ref[4:5, 0:1])                                # [N, 1]

    # ---- policy head: stripe-masked matmul decomposition (precomp. consts) --
    t = jnp.dot(y, wf_ref[...], preferred_element_type=jnp.float32)     # [N*HW, 210]
    t = t * mask_ref[...]                                               # hw == hw'
    red = jnp.dot(r, t, preferred_element_type=jnp.float32)             # [N, 210]
    logits = jnp.dot(red, cpol_ref[...],
                     preferred_element_type=jnp.float32) \
             + packed_ref[2:3, :N_MOVES]                                # [N, 7]

    m = jnp.max(logits, axis=-1, keepdims=True)
    e = jnp.exp(logits - m)
    probs = e * pl.reciprocal(jnp.sum(e, axis=-1, keepdims=True), approx=False)

    # ---- single packed output: [policy(7) | value(1)] ------------------------
    out_ref[:, :N_MOVES] = probs
    out_ref[:, N_MOVES:N_MOVES + 1] = v


# ----------------------------------------------------------------------------
# Parameter construction (deterministic, PyTorch layout conventions)
# ----------------------------------------------------------------------------
def make_params(key):
    ks = jax.random.split(key, 16)
    p = {}
    p["conv_w"] = 0.05 * jax.random.normal(ks[0], (3, C_IN, 1, 1), jnp.float32)
    p["conv_b"] = 0.05 * jax.random.normal(ks[1], (3,), jnp.float32)
    p["bn_gamma"] = 1.0 + 0.1 * jax.random.normal(ks[2], (3,), jnp.float32)
    p["bn_beta"] = 0.1 * jax.random.normal(ks[3], (3,), jnp.float32)
    p["bn_mean"] = 0.1 * jax.random.normal(ks[4], (3,), jnp.float32)
    p["bn_var"] = 1.0 + 0.1 * jax.random.uniform(ks[5], (3,), jnp.float32)

    p["fc1_w"] = 0.05 * jax.random.normal(ks[6], (32, 3 * H * W), jnp.float32)
    p["fc1_b"] = 0.05 * jax.random.normal(ks[7], (32,), jnp.float32)
    p["fc2_w"] = 0.05 * jax.random.normal(ks[8], (1, 32), jnp.float32)
    p["fc2_b"] = 0.05 * jax.random.normal(ks[9], (1,), jnp.float32)

    p["conv1_w"] = 0.05 * jax.random.normal(ks[10], (32, C_IN, 1, 1), jnp.float32)
    p["conv1_b"] = 0.05 * jax.random.normal(ks[11], (32,), jnp.float32)
    p["bn1_gamma"] = 1.0 + 0.1 * jax.random.normal(ks[12], (32,), jnp.float32)
    p["bn1_beta"] = 0.1 * jax.random.normal(ks[13], (32,), jnp.float32)
    p["bn1_mean"] = 0.1 * jax.random.normal(ks[14], (32,), jnp.float32)
    p["bn1_var"] = 1.0 + 0.1 * jax.random.uniform(ks[15], (32,), jnp.float32)

    kf = jax.random.split(ks[0], 2)
    p["fc_w"] = 0.05 * jax.random.normal(kf[0], (7, 32 * H * W), jnp.float32)
    p["fc_b"] = 0.05 * jax.random.normal(kf[1], (7,), jnp.float32)
    return p


# ----------------------------------------------------------------------------
# One-time parameter folding (hoisted out of the per-call path)
# ----------------------------------------------------------------------------
def prepare_params(params, n):
    # BatchNorm (eval mode) folded to scale/shift; conv bias folded into shift.
    s_pol = params["bn1_gamma"] / jnp.sqrt(params["bn1_var"] + EPS)
    s_val = params["bn_gamma"] / jnp.sqrt(params["bn_var"] + EPS)
    sh_pol = (params["conv1_b"] - params["bn1_mean"]) * s_pol + params["bn1_beta"]
    sh_val = (params["conv_b"] - params["bn_mean"]) * s_val + params["bn_beta"]
    scale = jnp.concatenate([s_pol, s_val])                         # [35]
    shift = jnp.concatenate([sh_pol, sh_val])                       # [35]

    # merged 1x1 conv weight [128, 35] (policy cols 0:32, value cols 32:35),
    # with the BN scale folded into the columns.
    w_pol = params["conv1_w"].reshape(C_POL, C_IN).T
    w_val = params["conv_w"].reshape(C_VAL, C_IN).T
    wcat = jnp.concatenate([w_pol, w_val], axis=1) * scale[None, :]  # [128, 35]

    # policy fc weight rearranged to [35, 210]; column q = j*HW + hw.
    # Rows 32..34 (value lanes of y) are zero so full y can feed the matmul.
    wf = jnp.transpose(params["fc_w"].reshape(N_MOVES, C_POL, HW),
                       (1, 0, 2)).reshape(C_POL, PQ)
    wf = jnp.concatenate([wf, jnp.zeros((C_VAL, PQ), jnp.float32)], axis=0)

    # value fc1 per-channel slabs: slab[c, m, j] = fc1_w[j, c*HW + (m % HW)]
    slab = jnp.transpose(params["fc1_w"].reshape(FC1_OUT, C_VAL, HW),
                         (1, 2, 0))                                  # [3, HW, 32]
    w1slab = jnp.tile(slab, (1, n, 1))                               # [3, n*HW, 32]

    # precomputed 0/1 reduction matrices + stripe mask (f32 constants)
    rows = jnp.arange(n * HW, dtype=jnp.int32)
    cols = jnp.arange(PQ, dtype=jnp.int32)
    r_mat = (rows[None, :] // HW ==
             jnp.arange(n, dtype=jnp.int32)[:, None]).astype(jnp.float32)      # [n, n*HW]
    c_pol = (cols[:, None] // HW ==
             jnp.arange(N_MOVES, dtype=jnp.int32)[None, :]).astype(jnp.float32)  # [210, 7]
    mask = ((rows % HW)[:, None] == (cols % HW)[None, :]).astype(jnp.float32)  # [n*HW, 210]

    # tiny vectors packed into a single [8, 128] VMEM tile
    packed = jnp.zeros((8, 128), jnp.float32)
    packed = packed.at[0, :C_TOT].set(shift)
    packed = packed.at[1, :FC1_OUT].set(params["fc1_b"])
    packed = packed.at[2, :N_MOVES].set(params["fc_b"])
    packed = packed.at[3, :FC1_OUT].set(params["fc2_w"].reshape(FC1_OUT))
    packed = packed.at[4, 0].set(params["fc2_b"][0])

    return dict(wcat=wcat, packed=packed, wf=wf, mask=mask,
                r=r_mat, cpol=c_pol, w1slab=w1slab)


# ----------------------------------------------------------------------------
# Forward pass wrapper (per-call path: transpose + one fused pallas_call)
# ----------------------------------------------------------------------------
def outblock_forward(s, prep):
    """s: [N, 128, H, W] float32 (PyTorch NCHW). Returns (p [N,7], v [N,1])."""
    n = s.shape[0]

    # layout: NCHW -> rows (n, hw) with channels on the 128-lane axis
    x = jnp.transpose(s, (0, 2, 3, 1)).reshape(n * HW, C_IN)        # [N*HW, 128]

    out = pl.pallas_call(
        outblock_kernel,
        out_shape=jax.ShapeDtypeStruct((n, N_MOVES + 1), jnp.float32),
        in_specs=[_VMEM] * 8,
        out_specs=_VMEM,
    )(x, prep["wcat"], prep["packed"], prep["wf"], prep["mask"],
      prep["r"], prep["cpol"], prep["w1slab"])

    return out[:, :N_MOVES], out[:, N_MOVES:N_MOVES + 1]


# ----------------------------------------------------------------------------
# Pure-JAX reference, written exactly in PyTorch NCHW / (c,h,w)-flatten terms.
# ----------------------------------------------------------------------------
def outblock_reference(s, params):
    def bn(x, g, b, m, var):
        return (x - m[None, :, None, None]) / jnp.sqrt(var + EPS)[None, :, None, None] \
               * g[None, :, None, None] + b[None, :, None, None]

    n = s.shape[0]
    # value head
    v = jnp.einsum("nchw,oc->nohw", s, params["conv_w"].reshape(3, C_IN)) \
        + params["conv_b"][None, :, None, None]
    v = jax.nn.relu(bn(v, params["bn_gamma"], params["bn_beta"],
                       params["bn_mean"], params["bn_var"]))
    v = v.reshape(n, 3 * H * W)                      # PyTorch (c,h,w) flatten
    v = jax.nn.relu(v @ params["fc1_w"].T + params["fc1_b"])
    v = jnp.tanh(v @ params["fc2_w"].T + params["fc2_b"])
    # policy head
    p = jnp.einsum("nchw,oc->nohw", s, params["conv1_w"].reshape(32, C_IN)) \
        + params["conv1_b"][None, :, None, None]
    p = jax.nn.relu(bn(p, params["bn1_gamma"], params["bn1_beta"],
                       params["bn1_mean"], params["bn1_var"]))
    p = p.reshape(n, 32 * H * W)
    p = p @ params["fc_w"].T + params["fc_b"]
    p = jnp.exp(jax.nn.log_softmax(p, axis=1))
    return p, v


if __name__ == "__main__":
    key = jax.random.PRNGKey(0)
    k_s, k_p = jax.random.split(key)

    s = jax.random.normal(k_s, (N_BATCH, C_IN, H, W), jnp.float32)
    params = make_params(k_p)

    # one-time parameter folding (hoisted out of the per-call path)
    prep = jax.tree_util.tree_map(jax.block_until_ready, prepare_params(params, N_BATCH))

    fwd = jax.jit(outblock_forward)
    p_out, v_out = jax.block_until_ready(fwd(s, prep))
    p_ref, v_ref = jax.block_until_ready(outblock_reference(s, params))

    assert p_out.shape == (N_BATCH, 7) and v_out.shape == (N_BATCH, 1)
    assert jnp.allclose(p_out, p_ref, atol=1e-5, rtol=1e-5), "policy mismatch"
    assert jnp.allclose(v_out, v_ref, atol=1e-5, rtol=1e-5), "value mismatch"
    assert jnp.allclose(jnp.sum(p_out, axis=1), 1.0, atol=1e-5)

    print("KERNEL_OK")
</pallas_src>

<mosaic_0001>
module attributes {stable_mosaic.version = 11 : i64} {
  func.func @outblock_kernel(%arg0: memref<60x128xf32, #tpu.memory_space<vmem>>, %arg1: memref<128x35xf32, #tpu.memory_space<vmem>>, %arg2: memref<8x128xf32, #tpu.memory_space<vmem>>, %arg3: memref<35x210xf32, #tpu.memory_space<vmem>>, %arg4: memref<60x210xf32, #tpu.memory_space<vmem>>, %arg5: memref<2x60xf32, #tpu.memory_space<vmem>>, %arg6: memref<210x7xf32, #tpu.memory_space<vmem>>, %arg7: memref<3x60x32xf32, #tpu.memory_space<vmem>>, %arg8: memref<2x8xf32, #tpu.memory_space<vmem>>) attributes {dimension_semantics = [], scalar_prefetch = 0 : i64, scratch_operands = 0 : i64, tpu.core_type = #tpu.core_type<tc>} {
    %c0 = arith.constant 0 : index
    %c0_0 = arith.constant 0 : index
    %0 = vector.load %arg0[%c0, %c0_0] : memref<60x128xf32, #tpu.memory_space<vmem>>, vector<60x128xf32>
    %c0_1 = arith.constant 0 : index
    %c0_2 = arith.constant 0 : index
    %1 = vector.load %arg1[%c0_1, %c0_2] : memref<128x35xf32, #tpu.memory_space<vmem>>, vector<128x35xf32>
    %cst = arith.constant dense<0.000000e+00> : vector<60x35xf32>
    %2 = tpu.matmul %0, %1, %cst {dimension_numbers = #tpu.dot_dimension_numbers<[1], [0], [0], [1], [0, 0, 1, 1], [], []>} : vector<60x128xf32>, vector<128x35xf32>, vector<60x35xf32> -> vector<60x35xf32>
    %c0_3 = arith.constant 0 : index
    %c0_4 = arith.constant 0 : index
    %3 = vector.load %arg2[%c0_3, %c0_4] : memref<8x128xf32, #tpu.memory_space<vmem>>, vector<1x35xf32>
    %4 = vector.broadcast %3 : vector<1x35xf32> to vector<60x35xf32>
    %5 = arith.addf %2, %4 : vector<60x35xf32>
    %cst_5 = arith.constant 0.000000e+00 : f32
    %6 = vector.broadcast %cst_5 : f32 to vector<60x35xf32>
    %7 = arith.maximumf %5, %6 : vector<60x35xf32>
    %c0_6 = arith.constant 0 : index
    %c0_7 = arith.constant 0 : index
    %8 = vector.load %arg5[%c0_6, %c0_7] : memref<2x60xf32, #tpu.memory_space<vmem>>, vector<2x60xf32>
    %9 = vector.extract_strided_slice %7 {offsets = [0, 32], sizes = [60, 1], strides = [1, 1]} : vector<60x35xf32> to vector<60x1xf32>
    %c0_8 = arith.constant 0 : index
    %c0_9 = arith.constant 0 : index
    %c0_10 = arith.constant 0 : index
    %10 = vector.load %arg7[%c0_8, %c0_9, %c0_10] : memref<3x60x32xf32, #tpu.memory_space<vmem>>, vector<1x60x32xf32>
    %11 = vector.shape_cast %10 : vector<1x60x32xf32> to vector<60x32xf32>
    %12 = vector.broadcast %9 : vector<60x1xf32> to vector<60x32xf32>
    %13 = arith.mulf %12, %11 : vector<60x32xf32>
    %14 = vector.extract_strided_slice %7 {offsets = [0, 33], sizes = [60, 1], strides = [1, 1]} : vector<60x35xf32> to vector<60x1xf32>
    %c1 = arith.constant 1 : index
    %c0_11 = arith.constant 0 : index
    %c0_12 = arith.constant 0 : index
    %15 = vector.load %arg7[%c1, %c0_11, %c0_12] : memref<3x60x32xf32, #tpu.memory_space<vmem>>, vector<1x60x32xf32>
    %16 = vector.shape_cast %15 : vector<1x60x32xf32> to vector<60x32xf32>
    %17 = vector.broadcast %14 : vector<60x1xf32> to vector<60x32xf32>
    %18 = arith.mulf %17, %16 : vector<60x32xf32>
    %19 = arith.addf %13, %18 : vector<60x32xf32>
    %20 = vector.extract_strided_slice %7 {offsets = [0, 34], sizes = [60, 1], strides = [1, 1]} : vector<60x35xf32> to vector<60x1xf32>
    %c2 = arith.constant 2 : index
    %c0_13 = arith.constant 0 : index
    %c0_14 = arith.constant 0 : index
    %21 = vector.load %arg7[%c2, %c0_13, %c0_14] : memref<3x60x32xf32, #tpu.memory_space<vmem>>, vector<1x60x32xf32>
    %22 = vector.shape_cast %21 : vector<1x60x32xf32> to vector<60x32xf32>
    %23 = vector.broadcast %20 : vector<60x1xf32> to vector<60x32xf32>
    %24 = arith.mulf %23, %22 : vector<60x32xf32>
    %25 = arith.addf %19, %24 : vector<60x32xf32>
    %cst_15 = arith.constant dense<0.000000e+00> : vector<2x32xf32>
    %26 = tpu.matmul %8, %25, %cst_15 {dimension_numbers = #tpu.dot_dimension_numbers<[1], [0], [0], [1], [0, 0, 1, 1], [], []>} : vector<2x60xf32>, vector<60x32xf32>, vector<2x32xf32> -> vector<2x32xf32>
    %c1_16 = arith.constant 1 : index
    %c0_17 = arith.constant 0 : index
    %27 = vector.load %arg2[%c1_16, %c0_17] : memref<8x128xf32, #tpu.memory_space<vmem>>, vector<1x32xf32>
    %28 = vector.broadcast %27 : vector<1x32xf32> to vector<2x32xf32>
    %29 = arith.addf %26, %28 : vector<2x32xf32>
    %cst_18 = arith.constant 0.000000e+00 : f32
    %30 = vector.broadcast %cst_18 : f32 to vector<2x32xf32>
    %31 = arith.maximumf %29, %30 : vector<2x32xf32>
    %c3 = arith.constant 3 : index
    %c0_19 = arith.constant 0 : index
    %32 = vector.load %arg2[%c3, %c0_19] : memref<8x128xf32, #tpu.memory_space<vmem>>, vector<1x32xf32>
    %33 = vector.broadcast %32 : vector<1x32xf32> to vector<2x32xf32>
    %34 = arith.mulf %31, %33 : vector<2x32xf32>
    %cst_20 = arith.constant dense<0.000000e+00> : vector<2xf32>
    %35 = vector.multi_reduction <add>, %34, %cst_20 [1] : vector<2x32xf32> to vector<2xf32>
    %36 = vector.shape_cast %35 : vector<2xf32> to vector<2x1xf32>
    %c4 = arith.constant 4 : index
    %c0_21 = arith.constant 0 : index
    %37 = vector.load %arg2[%c4, %c0_21] : memref<8x128xf32, #tpu.memory_space<vmem>>, vector<1x1xf32>
    %38 = vector.broadcast %37 : vector<1x1xf32> to vector<2x1xf32>
    %39 = arith.addf %36, %38 : vector<2x1xf32>
    %40 = math.tanh %39 : vector<2x1xf32>
    %c0_22 = arith.constant 0 : index
    %c0_23 = arith.constant 0 : index
    %41 = vector.load %arg3[%c0_22, %c0_23] : memref<35x210xf32, #tpu.memory_space<vmem>>, vector<35x210xf32>
    %cst_24 = arith.constant dense<0.000000e+00> : vector<60x210xf32>
    %42 = tpu.matmul %7, %41, %cst_24 {dimension_numbers = #tpu.dot_dimension_numbers<[1], [0], [0], [1], [0, 0, 1, 1], [], []>} : vector<60x35xf32>, vector<35x210xf32>, vector<60x210xf32> -> vector<60x210xf32>
    %c0_25 = arith.constant 0 : index
    %c0_26 = arith.constant 0 : index
    %43 = vector.load %arg4[%c0_25, %c0_26] : memref<60x210xf32, #tpu.memory_space<vmem>>, vector<60x210xf32>
    %44 = arith.mulf %42, %43 : vector<60x210xf32>
    %cst_27 = arith.constant dense<0.000000e+00> : vector<2x210xf32>
    %45 = tpu.matmul %8, %44, %cst_27 {dimension_numbers = #tpu.dot_dimension_numbers<[1], [0], [0], [1], [0, 0, 1, 1], [], []>} : vector<2x60xf32>, vector<60x210xf32>, vector<2x210xf32> -> vector<2x210xf32>
    %c0_28 = arith.constant 0 : index
    %c0_29 = arith.constant 0 : index
    %46 = vector.load %arg6[%c0_28, %c0_29] : memref<210x7xf32, #tpu.memory_space<vmem>>, vector<210x7xf32>
    %cst_30 = arith.constant dense<0.000000e+00> : vector<2x7xf32>
    %47 = tpu.matmul %45, %46, %cst_30 {dimension_numbers = #tpu.dot_dimension_numbers<[1], [0], [0], [1], [0, 0, 1, 1], [], []>} : vector<2x210xf32>, vector<210x7xf32>, vector<2x7xf32> -> vector<2x7xf32>
    %c2_31 = arith.constant 2 : index
    %c0_32 = arith.constant 0 : index
    %48 = vector.load %arg2[%c2_31, %c0_32] : memref<8x128xf32, #tpu.memory_space<vmem>>, vector<1x7xf32>
    %49 = vector.broadcast %48 : vector<1x7xf32> to vector<2x7xf32>
    %50 = arith.addf %47, %49 : vector<2x7xf32>
    %cst_33 = arith.constant dense<0xFF800000> : vector<2xf32>
    %51 = vector.multi_reduction <maximumf>, %50, %cst_33 [1] : vector<2x7xf32> to vector<2xf32>
    %52 = vector.shape_cast %51 : vector<2xf32> to vector<2x1xf32>
    %53 = vector.broadcast %52 : vector<2x1xf32> to vector<2x7xf32>
    %54 = arith.subf %50, %53 : vector<2x7xf32>
    %55 = math.exp %54 : vector<2x7xf32>
    %cst_34 = arith.constant dense<0.000000e+00> : vector<2xf32>
    %56 = vector.multi_reduction <add>, %55, %cst_34 [1] : vector<2x7xf32> to vector<2xf32>
    %57 = vector.shape_cast %56 : vector<2xf32> to vector<2x1xf32>
    %58 = tpu.reciprocal %57 : vector<2x1xf32> -> vector<2x1xf32>
    %59 = vector.broadcast %58 : vector<2x1xf32> to vector<2x7xf32>
    %60 = arith.mulf %55, %59 : vector<2x7xf32>
    %c0_35 = arith.constant 0 : index
    %c0_36 = arith.constant 0 : index
    %61 = vector.load %arg8[%c0_35, %c0_36] : memref<2x8xf32, #tpu.memory_space<vmem>>, vector<2x7xf32>
    tpu.vector_store %arg8[%c0_35, %c0_36], %60 {strides = array<i32>} : memref<2x8xf32, #tpu.memory_space<vmem>>, vector<2x7xf32>,
    %c0_37 = arith.constant 0 : index
    %c7 = arith.constant 7 : index
    %62 = vector.load %arg8[%c0_37, %c7] : memref<2x8xf32, #tpu.memory_space<vmem>>, vector<2x1xf32>
    tpu.vector_store %arg8[%c0_37, %c7], %40 {strides = array<i32>} : memref<2x8xf32, #tpu.memory_space<vmem>>, vector<2x1xf32>,
    return
  }
}

</mosaic_0001>

<bundles_post_ra>
// kernel: outblock_forward.1
= control target key start
LH: loop header
LB: loop body
LE: loop exit
PB: predicated region body
PF: predicated region fallthrough
CT: control target
= control target key end

     0   :  { %vm470_vm0 = vcmask 1042432   ;;  %v1110_v45 = vmov 33   ;;  %v1111_v46 = vmov 32   ;;  %v1112_v48 = vmov 0.0   ;;  %s1117_s17 = smov 7   ;;  %s1565_s1 = inlined_call_operand.vmem [shape: f32[128,35], index: 1, kind: input, shape index: {}]   ;;  %s1566_s0 = inlined_call_operand.vmem [shape: f32[60,128], index: 0, kind: input, shape index: {}]   ;;  %s1567_s3 = inlined_call_operand.vmem [shape: f32[35,210], index: 3, kind: input, shape index: {}]   ;;  %s1568_s2 = inlined_call_operand.vmem [shape: f32[8,128], index: 2, kind: input, shape index: {}]   ;;  %s1569_s6 = inlined_call_operand.vmem [shape: f32[210,7], index: 6, kind: input, shape index: {}]   ;;  %s1570_s7 = inlined_call_operand.vmem [shape: f32[3,60,32], index: 7, kind: input, shape index: {}]   ;;  %s1571_s5 = inlined_call_operand.vmem [shape: f32[2,60], index: 5, kind: input, shape index: {}]   ;;  %s1572_s4 = inlined_call_operand.vmem [shape: f32[60,210], index: 4, kind: input, shape index: {}]   ;;  %s1573_s8 = inlined_call_operand.vmem [shape: f32[2,8], index: 8, kind: output, shape index: {}]  }
   0x1   :  { %v37_v0 = vld [vmem:[%s1565_s1] sm:$0xff]  ;;  %v38_v1 = vld [vmem:[%s1565_s1 + $0x8] sm:$0xff]  ;;  %v39_v2 = vld [vmem:[%s1565_s1 + $0x10] sm:$0xff]  ;;  %1085 = vset.pattern.permute.xlu1 %v1110_v45  ;;  %1084 = vset.pattern.permute.xlu0 %v1111_v46  ;;  %vm453_vm1 = vcmask 285696   ;;  %v1113_v60 = vmov 34   ;;  %vm1115_vm2 = vmmov 0  }
   0x2   :  { %v966_v3 = vpack.c.bf16 %v38_v1, %v37_v0  ;;  %v40_v4 = vld [vmem:[%s1565_s1 + $0x18] sm:$0xff]  ;;  %v41_v6 = vld [vmem:[%s1565_s1 + $0x20] sm:$0xff]  ;;  %v42_v7 = vld [vmem:[%s1565_s1 + $0x28] sm:$0xff]  ;;  %541 = vmatprep.mubr.f32.mxu1 %v1112_v48  ;;  %vm351_vm3 = vcmask 1043456   ;;  %vm1116_vm4 = vmmov 1   ;;  %vm347_vm6 = vcmask 490496  }
   0x3   :  { %v970_v5 = vpack.c.bf16 %v40_v4, %v39_v2  ;;  %v974_v8 = vpack.c.bf16 %v42_v7, %v41_v6  ;;  %v29_v9 = vld [vmem:[%s1566_s0] sm:$0xff]  ;;  %v43_v10 = vld [vmem:[%s1565_s1 + $0x30] sm:$0xff]  ;;  %v44_v11 = vld [vmem:[%s1565_s1 + $0x38] sm:$0xff]  ;;  %vm735_vm7 = vcmask 1041408   ;;  %vm432_vm8 = vcmask 254976  }
   0x4   :  { %967 = vmatprep.subr.bf16.mxu0 %v966_v3  ;;  %935 = vmatprep.mubr.f32.mxu0 %v29_v9  ;;  %v444_v12 = vld [vmem:[%s1567_s3 + $0x8] sm:$0xff]  ;;  %v446_v13 = vld [vmem:[%s1567_s3 + $0x18] sm:$0xff]  ;;  %v443_v14 = vld [vmem:[%s1567_s3] sm:$0xff]  ;;  %v978_v15 = vpack.c.bf16 %v44_v11, %v43_v10  ;;  %vm731_vm9 = vcmask 670720   ;;  %vm809_vm10 = vcmask 50176   ;;  %vm826_vm11 = vcmask 58424  }
   0x5   :  { %969 = vmatpush3.bf16.msra.mxu0 %v966_v3  ;;  %v1011_v16 = vpack.c.bf16 %v446_v13, %v444_v12  ;;  %v445_v17 = vld [vmem:[%s1567_s3 + $0x10] sm:$0xff]  ;;  %v45_v18 = vld [vmem:[%s1565_s1 + $0x40] sm:$0xff]  ;;  %v46_v19 = vld [vmem:[%s1565_s1 + $0x48] sm:$0xff] }
   0x6   :  { %971 = vmatprep.subr.bf16.mxu0 %v970_v5  ;;  %v1013_v20 = vpack.c.bf16 %v445_v17, %v443_v14  ;;  %v982_v21 = vpack.c.bf16 %v46_v19, %v45_v18  ;;  %v47_v22 = vld [vmem:[%s1565_s1 + $0x50] sm:$0xff]  ;;  %v48_v23 = vld [vmem:[%s1565_s1 + $0x58] sm:$0xff]  ;;  %v49_v25 = vld [vmem:[%s1565_s1 + $0x60] sm:$0xff] }
   0x7   :  { %1012 = vmatprep.subr.bf16.mxu1 %v1011_v16  ;;  %v986_v24 = vpack.c.bf16 %v48_v23, %v47_v22  ;;  %v50_v26 = vld [vmem:[%s1565_s1 + $0x68] sm:$0xff]  ;;  %v51_v28 = vld [vmem:[%s1565_s1 + $0x70] sm:$0xff]  ;;  %v52_v29 = vld [vmem:[%s1565_s1 + $0x78] sm:$0xff] }
   0x8   :  { %1014 = vmatpush1.bf16.msra.mxu1 %v1013_v20  ;;  %v990_v27 = vpack.c.bf16 %v50_v26, %v49_v25  ;;  %v994_v30 = vpack.c.bf16 %v52_v29, %v51_v28  ;;  %v30_v31 = vld [vmem:[%s1566_s0 + $0x8] sm:$0xff]  ;;  %v31_v32 = vld [vmem:[%s1566_s0 + $0x10] sm:$0xff]  ;;  %v32_v33 = vld [vmem:[%s1566_s0 + $0x18] sm:$0xff] }
   0x9   :  { %973 = vmatpush3.bf16.msra.mxu0 %v970_v5  ;;  %v33_v34 = vld [vmem:[%s1566_s0 + $0x20] sm:$0xff]  ;;  %v34_v35 = vld [vmem:[%s1566_s0 + $0x28] sm:$0xff]  ;;  %v35_v36 = vld [vmem:[%s1566_s0 + $0x30] sm:$0xff] }
   0xa   :  { %975 = vmatprep.subr.bf16.mxu0 %v974_v8  ;;  %v36_v37 = vld [vmem:[%s1566_s0 + $0x38] sm:$0xf]  ;;  %v448_v38 = vld [vmem:[%s1567_s3 + $0x28] sm:$0xff]  ;;  %v447_v41 = vld [vmem:[%s1567_s3 + $0x20] sm:$0xff] }
   0xb   :  { %v450_v39 = vld [vmem:[%s1567_s3 + $0x38] sm:$0xff]  ;;  %v449_v42 = vld [vmem:[%s1567_s3 + $0x30] sm:$0xff]  ;;  %v452_v44 = vld [vmem:[%s1567_s3 + $0x48] sm:$0x7] }
   0xc   :  { %v1015_v40 = vpack.c.bf16 %v450_v39, %v448_v38  ;;  %v1017_v43 = vpack.c.bf16 %v449_v42, %v447_v41  ;;  %v451_v47 = vld [vmem:[%s1567_s3 + $0x40] sm:$0x7]  ;;  %v700_v13 = vld [vmem:[%s1569_s6 + $0x8] sm:$0xff]  ;;  %v701_v14 = vld [vmem:[%s1569_s6 + $0x10] sm:$0xff] }
   0xd   :  { %977 = vmatpush3.bf16.msra.mxu0 %v974_v8  ;;  %v832_v49 = vld [vmem:[%s1568_s2] ss:$0 sm:$0xff]  ;;  %v1114_v8 = vmov 0.0|0.0   ;;  %v702_v16 = vld [vmem:[%s1569_s6 + $0x18] sm:$0xff]  ;;  %v705_v25 = vld [vmem:[%s1569_s6 + $0x30] sm:$0xff] }
   0xe   :  { %979 = vmatprep.subr.bf16.mxu0 %v978_v15  ;;  %1016 = vmatprep.subr.bf16.mxu1 %v1015_v40  ;;  %v699_v12 = vld [vmem:[%s1569_s6] sm:$0xff]  ;;  %v1041_v19 = vpack.c.bf16 %v702_v16, %v701_v14  ;;  %v706_v26 = vld [vmem:[%s1569_s6 + $0x38] sm:$0xff]  ;;  %v173_v28 = vld [vmem:[%s1570_s7 + $0x8] sm:$0xff] }
   0xf   :  { %1018 = vmatpush1.bf16.msra.mxu1 %v1017_v43  ;;  %v703_v20 = vld [vmem:[%s1569_s6 + $0x20] sm:$0xff]  ;;  %vm1445_vm5 = vmpackc.low %vm351_vm3, %vm1116_vm4 }
  0x10   :  { %854 = vmatprep.subr.msk.mxu1 %vm470_vm0, %v452_v44  ;;  %v172_v29 = vld [vmem:[%s1570_s7] sm:$0xff] }
  0x11   :  { %981 = vmatpush3.bf16.msra.mxu0 %v978_v15  ;;  %v1038_v15 = vpack.c.bf16 %v700_v13, %v699_v12 }
  0x12   :  { %983 = vmatprep.subr.bf16.mxu0 %v982_v21 }
  0x13   :  { %855 = vmatpush1.msk.msra.mxu1 %vm470_vm0, %v451_v47  ;;  %v709_v47 = vld [vmem:[%s1569_s6 + $0x50] sm:$0xff] }
  0x14   :  { %1037 = vmatprep.subr.bf16.mxu1 %v1114_v8 }
  0x15   :  { %985 = vmatpush3.bf16.msra.mxu0 %v982_v21  ;;  %v704_v21 = vld [vmem:[%s1569_s6 + $0x28] sm:$0xff] }
  0x16   :  { %987 = vmatprep.subr.bf16.mxu0 %v986_v24  ;;  %v1044_v23 = vpack.c.bf16 %v704_v21, %v703_v20 }
  0x19   :  { %989 = vmatpush3.bf16.msra.mxu0 %v986_v24 }
  0x1a   :  { %991 = vmatprep.subr.bf16.mxu0 %v990_v27 }
  0x1d   :  { %993 = vmatpush3.bf16.msra.mxu0 %v990_v27  ;;  %v834_v27 = vld [vmem:[%s1570_s7 + $0x48] sm:$0xff] }
  0x1e   :  { %995 = vmatprep.subr.bf16.mxu0 %v994_v30 }
  0x21   :  { %997 = vmatpush3.bf16.msra.mxu0 %v994_v30  ;;  %v842_v30 = vld [vmem:[%s1570_s7 + $0x88] sm:$0xff] }
  0x22   :  { %998 = vmatprep.subr.bf16.mxu0 %v1114_v8 }
  0x24   :  { %936 = vmatmul.mubr.f32.vlgmr.msra.gmra.mrb[0].mxu0 %v30_v31  ;;  %v833_v31 = vld [vmem:[%s1570_s7 + $0x40] sm:$0xff] }
  0x25   :  { %938 = vmatprep.mubr.f32.mxu0 %v31_v32  ;;  %v1047_v32 = vpack.c.bf16 %v706_v26, %v705_v25 }
  0x28   :  { %939 = vmatmul.mubr.f32.gmra.mrb[2].mxu0 %v32_v33 }
  0x29   :  { %941 = vmatprep.mubr.f32.mxu0 %v33_v34 }
  0x2c   :  { %942 = vmatmul.mubr.f32.gmra.mrb[4].mxu0 %v34_v35  ;;  %v707_v35 = vld [vmem:[%s1569_s6 + $0x40] sm:$0xff] }
  0x2d   :  { %944 = vmatprep.mubr.f32.mxu0 %v35_v36  ;;  %v708_v36 = vld [vmem:[%s1569_s6 + $0x48] sm:$0xff] }
  0x2e   :  { %v1050_v43 = vpack.c.bf16 %v708_v36, %v707_v35 }
  0x30   :  { %945 = vmatmul.mubr.f32.gmra.mrb[6].mxu0 %v36_v37  ;;  %v841_v37 = vld [vmem:[%s1570_s7 + $0x80] sm:$0xff] }
  0x31   :  { %963 = vmatprep.mubr.msk.f32.mxu0 %vm1115_vm2, %v1112_v48 }
  0xf7   :  { %v937_v50 = vpop.f32.mrb[0].mxu0 }
  0xf8   :  { %v130_v51 = vadd.f32 %v937_v50, %v832_v49  ;;  %v124_v52 = vpop.f32.mrb[1].mxu0 }
  0xf9   :  { %v125_v53 = vadd.f32 %v832_v49, %v124_v52 }
  0xfa   :  { %v164_v54 = vmax.f32 %v130_v51, 0.0 }
  0xfb   :  { %v163_v55 = vmax.f32 %v125_v53, 0.0  ;;  %v940_v56 = vpop.f32.mrb[2].mxu0 }
  0xfc   :  { %242 = vperm.xlu1 %1085, %v164_v54   ;;  %187 = vperm.xlu0 %1084, %v164_v54   ;;  %v134_v57 = vpop.f32.mrb[3].mxu0  ;;  %v140_v0 = vadd.f32 %v940_v56, %v832_v49  ;;  %v712_v56 = vld [vmem:[%s1569_s6 + $0x68] sm:$0xff] }
  0xfd   :  { %856 = vmatmul.mubr.msk.f32.vlgmr.msra.gmra.mrb[0].mxu1 %vm453_vm1, %v163_v55  ;;  %v135_v58 = vadd.f32 %v832_v49, %v134_v57 }
  0xfe   :  { %547 = vmatprep.mubr.f32.mxu1 %v1112_v48  ;;  %v166_v3 = vmax.f32 %v140_v0, 0.0  ;;  %1039 = vmatpush1.bf16.msra.mxu1 %v1038_v15 }
  0xff   :  { %v943_v59 = vpop.f32.mrb[4].mxu0  ;;  %v165_v62 = vmax.f32 %v135_v58, 0.0  ;;  %1040 = vmatprep.subr.bf16.mxu1 %v1114_v8 }
 0x100   :  { %1086 = vset.pattern.permute.xlu1 %v1113_v60  ;;  %182 = vperm.xlu0 %1084, %v163_v55   ;;  %v144_v61 = vpop.f32.mrb[5].mxu0  ;;  %v150_v5 = vadd.f32 %v943_v59, %v832_v49  ;;  %v713_v59 = vld [vmem:[%s1569_s6 + $0x70] sm:$0xff] }
 0x101   :  { %299 = vperm.xlu1 %1086, %v164_v54   ;;  %857 = vmatmul.mubr.msk.f32.gmra.mrb[2].mxu1 %vm453_vm1, %v164_v54  ;;  %v145_v2 = vadd.f32 %v832_v49, %v144_v61 }
 0x102   :  { %553 = vmatprep.mubr.f32.mxu1 %v1112_v48  ;;  %v168_v7 = vmax.f32 %v150_v5, 0.0  ;;  %1042 = vmatpush1.bf16.msra.mxu1 %v1041_v19  ;;  %v174_v5 = vld [vmem:[%s1570_s7 + $0x10] sm:$0xff] }
 0x103   :  { %v946_v63 = vpop.f32.mrb[6].mxu0  ;;  %v167_v4 = vmax.f32 %v145_v2, 0.0  ;;  %1043 = vmatprep.subr.bf16.mxu1 %v1114_v8  ;;  %v715_v2 = vld [vmem:[%s1569_s6 + $0x80] sm:$0xff] }
 0x104   :  { %1088 = vset.pattern.permute.xlu0 %v1113_v60  ;;  %v154_v1 = vpop.f32.mrb[7].mxu0  ;;  %v160_v10 = vadd.f32 %v946_v63, %v832_v49 }
 0x105   :  { %1087 = vset.pattern.permute.xlu1 %v1110_v45  ;;  %295 = vperm.xlu0 %1088, %v163_v55   ;;  %v155_v6 = vadd.f32 %v832_v49, %v154_v1  ;;  %v710_v49 = vld [vmem:[%s1569_s6 + $0x58] sm:$0xff] }
 0x106   :  { %858 = vmatmul.mubr.msk.f32.gmra.mrb[4].mxu1 %vm453_vm1, %v165_v62  ;;  %238 = vperm.xlu1 %1087, %v163_v55   ;;  %v170_v11 = vmax.f32 %v160_v10, 0.0  ;;  %v1053_v53 = vpack.c.bf16 %v710_v49, %v709_v47  ;;  %v711_v55 = vld [vmem:[%s1569_s6 + $0x60] sm:$0xff]  ;;  %v175_v1 = vld [vmem:[%s1570_s7 + $0x18] sm:$0xff] }
 0x107   :  { %559 = vmatprep.mubr.f32.mxu1 %v1112_v48  ;;  %v169_v9 = vmax.f32 %v155_v6, 0.0  ;;  %1045 = vmatpush1.bf16.msra.mxu1 %v1044_v23  ;;  %v1056_v58 = vpack.c.bf16 %v712_v56, %v711_v55  ;;  %v835_v6 = vld [vmem:[%s1570_s7 + $0x50] sm:$0xff] }
 0x108   :  { %1046 = vmatprep.subr.bf16.mxu1 %v1114_v8 }
 0x109   :  { %1089 = vset.pattern.permute.xlu0 %v1111_v46 }
 0x10a   :  { %859 = vmatmul.mubr.msk.f32.gmra.mrb[6].mxu1 %vm453_vm1, %v166_v3  ;;  %250 = vperm.xlu1 %1087, %v166_v3  }
 0x10b   :  { %197 = vperm.xlu0 %1089, %v166_v3   ;;  %565 = vmatprep.mubr.f32.mxu1 %v1112_v48 }
 0x10c   :  { %1048 = vmatpush1.bf16.msra.mxu1 %v1047_v32 }
 0x10d   :  { %1049 = vmatprep.subr.bf16.mxu1 %v1114_v8 }
 0x10e   :  { %860 = vmatmul.mubr.msk.f32.gmra.mrb[8].mxu1 %vm453_vm1, %v167_v4  ;;  %1090 = vset.pattern.permute.xlu1 %v1113_v60 }
 0x10f   :  { %1093 = vset.pattern.permute.xlu0 %v1113_v60  ;;  %307 = vperm.xlu1 %1090, %v166_v3   ;;  %v716_v3 = vld [vmem:[%s1569_s6 + $0x88] sm:$0xff] }
 0x110   :  { %303 = vperm.xlu0 %1093, %v165_v62   ;;  %571 = vmatprep.mubr.f32.mxu1 %v1112_v48  ;;  %v1062_v10 = vpack.c.bf16 %v716_v3, %v715_v2 }
 0x111   :  { %1051 = vmatpush1.bf16.msra.mxu1 %v1050_v43 }
 0x112   :  { %861 = vmatmul.mubr.msk.f32.gmra.mrb[10].mxu1 %vm453_vm1, %v168_v7  ;;  %1052 = vmatprep.subr.bf16.mxu1 %v1114_v8 }
 0x113   :  { %1091 = vset.pattern.permute.xlu1 %v1111_v46  ;;  %577 = vmatprep.mubr.f32.mxu1 %v1112_v48 }
 0x114   :  { %1094 = vset.pattern.permute.xlu0 %v1111_v46  ;;  %192 = vperm.xlu1 %1091, %v165_v62  }
 0x115   :  { %207 = vperm.xlu0 %1094, %v168_v7   ;;  %1054 = vmatpush1.bf16.msra.mxu1 %v1053_v53 }
 0x116   :  { %862 = vmatmul.mubr.msk.f32.gmra.mrb[12].mxu1 %vm453_vm1, %v169_v9  ;;  %1055 = vmatprep.subr.bf16.mxu1 %v1114_v8 }
 0x117   :  { %583 = vmatprep.mubr.f32.mxu1 %v1112_v48 }
 0x118   :  { %1092 = vset.pattern.permute.xlu1 %v1110_v45 }
 0x119   :  { %1098 = vset.pattern.permute.xlu0 %v1113_v60  ;;  %246 = vperm.xlu1 %1092, %v165_v62   ;;  %v836_v62 = vld [vmem:[%s1570_s7 + $0x58] sm:$0xff] }
 0x11a   :  { %311 = vperm.xlu0 %1098, %v167_v4   ;;  %863 = vmatmul.mubr.msk.f32.gmra.mrb[14].mxu1 %vm453_vm1, %v170_v11 }
 0x11b   :  { %1057 = vmatpush1.bf16.msra.mxu1 %v1056_v58  ;;  %v847_v58 = vld [vmem:[%s1570_s7 + $0xb0] sm:$0xff] }
 0x11c   :  { %1058 = vmatprep.subr.bf16.mxu1 %v1114_v8 }
 0x11d   :  { %258 = vperm.xlu1 %1092, %v168_v7  }
 0x11e   :  { %1099 = vset.pattern.permute.xlu0 %v1111_v46 }
 0x11f   :  { %217 = vperm.xlu0 %1099, %v170_v11  }
 0x121   :  { %1095 = vset.pattern.permute.xlu1 %v1113_v60 }
 0x122   :  { %315 = vperm.xlu1 %1095, %v168_v7  }
 0x123   :  { %1102 = vset.pattern.permute.xlu0 %v1113_v60 }
 0x124   :  { %319 = vperm.xlu0 %1102, %v169_v9  }
 0x126   :  { %1096 = vset.pattern.permute.xlu1 %v1111_v46 }
 0x127   :  { %202 = vperm.xlu1 %1096, %v167_v4  }
 0x12b   :  { %1097 = vset.pattern.permute.xlu1 %v1110_v45 }
 0x12c   :  { %254 = vperm.xlu1 %1097, %v167_v4   ;;  %v844_v4 = vld [vmem:[%s1570_s7 + $0x98] sm:$0xff] }
 0x130   :  { %266 = vperm.xlu1 %1097, %v170_v11  }
 0x134   :  { %1100 = vset.pattern.permute.xlu1 %v1111_v46 }
 0x135   :  { %212 = vperm.xlu1 %1100, %v169_v9  }
 0x139   :  { %1101 = vset.pattern.permute.xlu1 %v1110_v45 }
 0x13a   :  { %262 = vperm.xlu1 %1101, %v169_v9  }
 0x13e   :  { %1103 = vset.pattern.permute.xlu1 %v1113_v60  ;;  %v714_v60 = vld [vmem:[%s1569_s6 + $0x78] sm:$0xff] }
 0x13f   :  { %323 = vperm.xlu1 %1103, %v170_v11   ;;  %v1059_v0 = vpack.c.bf16 %v714_v60, %v713_v59  ;;  %v843_v11 = vld [vmem:[%s1570_s7 + $0x90] sm:$0xff]  ;;  %v848_v60 = vld [vmem:[%s1570_s7 + $0xb8] sm:$0xf] }
 0x141   :  { %1060 = vmatpush1.bf16.msra.mxu1 %v1059_v0 }
 0x142   :  { %1061 = vmatprep.subr.bf16.mxu1 %v1114_v8 }
 0x145   :  { %1063 = vmatpush1.bf16.msra.mxu1 %v1062_v10 }
 0x146   :  { %1064 = vmatprep.subr.bf16.mxu1 %v1114_v8 }
 0x17b   :  { %v243_v17 = vpop.permute.xlu1 %242  ;;  %v188_v18 = vpop.permute.xlu0 %187 }
 0x17c   :  { %v270_v33 = vmul.f32 %v834_v27, %v243_v17  ;;  %v221_v34 = vmul.f32 %v188_v18, %v173_v28  ;;  %v838_v27 = vld [vmem:[%s1570_s7 + $0x68] sm:$0xff] }
 0x17d   :  { %v177_v28 = vld [vmem:[%s1570_s7 + $0x28] sm:$0xff] }
 0x17e   :  { %v278_v44 = vadd.f32 %v270_v33, %v221_v34  ;;  %v845_v33 = vld [vmem:[%s1570_s7 + $0xa0] sm:$0xff] }
 0x17f   :  { %v183_v22 = vpop.permute.xlu0 %182 }
 0x180   :  { %v300_v24 = vpop.permute.xlu1 %299  ;;  %v220_v40 = vmul.f32 %v183_v22, %v172_v29  ;;  %v846_v29 = vld [vmem:[%s1570_s7 + $0xa8] sm:$0xff] }
 0x181   :  { %v327_v41 = vmul.f32 %v842_v30, %v300_v24  ;;  %v176_v30 = vld [vmem:[%s1570_s7 + $0x20] sm:$0xff] }
 0x183   :  { %v335_v51 = vadd.f32 %v327_v41, %v278_v44 }
 0x184   :  { %v296_v38 = vpop.permute.xlu0 %295 }
 0x185   :  { %v239_v39 = vpop.permute.xlu1 %238  ;;  %v326_v45 = vmul.f32 %v841_v37, %v296_v38 }
 0x186   :  { %v269_v42 = vmul.f32 %v833_v31, %v239_v39  ;;  %v837_v31 = vld [vmem:[%s1570_s7 + $0x60] sm:$0xff] }
 0x188   :  { %v277_v46 = vadd.f32 %v269_v42, %v220_v40 }
 0x189   :  { %v251_v50 = vpop.permute.xlu1 %250 }
 0x18a   :  { %v334_v52 = vadd.f32 %v326_v45, %v277_v46  ;;  %v198_v61 = vpop.permute.xlu0 %197  ;;  %v272_v7 = vmul.f32 %v836_v62, %v251_v50  ;;  %v839_v50 = vld [vmem:[%s1570_s7 + $0x70] sm:$0xff] }
 0x18b   :  { %v223_v9 = vmul.f32 %v198_v61, %v175_v1 }
 0x18c   :  { %v999_v54 = vpack.c.bf16 %v335_v51, %v334_v52  ;;  %v840_v51 = vld [vmem:[%s1570_s7 + $0x78] sm:$0xf]  ;;  %v178_v52 = vld [vmem:[%s1570_s7 + $0x30] sm:$0xff] }
 0x18d   :  { %v280_v17 = vadd.f32 %v272_v7, %v223_v9  ;;  %v1454_v7 = vld [vmem:[%s1571_s5] sm:$0x3] }
 0x18e   :  { %v308_v57 = vpop.permute.xlu1 %307  ;;  %1000 = vmatpush3.bf16.msra.mxu0 %v999_v54  ;;  %v179_v54 = vld [vmem:[%s1570_s7 + $0x38] sm:$0xf] }
 0x18f   :  { %1001 = vmatprep.subr.bf16.mxu0 %v1114_v8  ;;  %v304_v12 = vpop.permute.xlu0 %303  ;;  %v329_v14 = vmul.f32 %v844_v4, %v308_v57 }
 0x190   :  { %v328_v18 = vmul.f32 %v843_v11, %v304_v12  ;;  %v590_v11 = vld [vmem:[%s1572_s4] sm:$0xff]  ;;  %v592_v12 = vld [vmem:[%s1572_s4 + $0x10] sm:$0xff] }
 0x191   :  { %v337_v21 = vadd.f32 %v329_v14, %v280_v17  ;;  %v593_v14 = vld [vmem:[%s1572_s4 + $0x18] sm:$0xff] }
 0x193   :  { %v193_v63 = vpop.permute.xlu1 %192 }
 0x194   :  { %v222_v15 = vmul.f32 %v193_v63, %v174_v5  ;;  %v208_v25 = vpop.permute.xlu0 %207  ;;  %v720_v5 = vld [vmem:[%s1569_s6 + $0xa8] sm:$0xff] }
 0x195   :  { %v225_v36 = vmul.f32 %v208_v25, %v177_v28  ;;  %v594_v25 = vld [vmem:[%s1572_s4 + $0x20] sm:$0xff]  ;;  %v597_v28 = vld [vmem:[%s1572_s4 + $0x38] sm:$0xff] }
 0x198   :  { %v247_v13 = vpop.permute.xlu1 %246 }
 0x199   :  { %v271_v16 = vmul.f32 %v835_v6, %v247_v13  ;;  %v312_v34 = vpop.permute.xlu0 %311  ;;  %v591_v13 = vld [vmem:[%s1572_s4 + $0x8] sm:$0xff] }
 0x19a   :  { %v330_v40 = vmul.f32 %v845_v33, %v312_v34 }
 0x19b   :  { %v279_v19 = vadd.f32 %v271_v16, %v222_v15 }
 0x19c   :  { %v259_v20 = vpop.permute.xlu1 %258 }
 0x19d   :  { %v336_v22 = vadd.f32 %v328_v18, %v279_v19  ;;  %v274_v32 = vmul.f32 %v838_v27, %v259_v20  ;;  %v595_v27 = vld [vmem:[%s1572_s4 + $0x28] sm:$0xff] }
 0x19e   :  { %v218_v49 = vpop.permute.xlu0 %217 }
 0x19f   :  { %v1002_v23 = vpack.c.bf16 %v337_v21, %v336_v22  ;;  %v282_v41 = vadd.f32 %v274_v32, %v225_v36  ;;  %v227_v61 = vmul.f32 %v218_v49, %v179_v54  ;;  %v602_v54 = vld [vmem:[%s1572_s4 + $0x60] sm:$0xff] }
 0x1a1   :  { %v316_v24 = vpop.permute.xlu1 %315  ;;  %1003 = vmatpush3.bf16.msra.mxu0 %v1002_v23 }
 0x1a2   :  { %1004 = vmatprep.subr.bf16.mxu0 %v1114_v8  ;;  %v331_v37 = vmul.f32 %v846_v29, %v316_v24 }
 0x1a3   :  { %v320_v59 = vpop.permute.xlu0 %319 }
 0x1a4   :  { %v339_v44 = vadd.f32 %v331_v37, %v282_v41  ;;  %v332_v0 = vmul.f32 %v847_v58, %v320_v59  ;;  %v599_v41 = vld [vmem:[%s1572_s4 + $0x48] sm:$0xff] }
 0x1a6   :  { %v203_v26 = vpop.permute.xlu1 %202 }
 0x1a7   :  { %v224_v38 = vmul.f32 %v203_v26, %v176_v30  ;;  %v596_v26 = vld [vmem:[%s1572_s4 + $0x30] sm:$0xff] }
 0x1ab   :  { %v255_v35 = vpop.permute.xlu1 %254 }
 0x1ac   :  { %v273_v39 = vmul.f32 %v837_v31, %v255_v35 }
 0x1ae   :  { %v281_v42 = vadd.f32 %v273_v39, %v224_v38  ;;  %v598_v39 = vld [vmem:[%s1572_s4 + $0x40] sm:$0xff] }
 0x1af   :  { %v267_v43 = vpop.permute.xlu1 %266 }
 0x1b0   :  { %v338_v45 = vadd.f32 %v330_v40, %v281_v42  ;;  %v276_v56 = vmul.f32 %v840_v51, %v267_v43  ;;  %v600_v40 = vld [vmem:[%s1572_s4 + $0x50] sm:$0xff]  ;;  %v601_v42 = vld [vmem:[%s1572_s4 + $0x58] sm:$0xff] }
 0x1b2   :  { %v1005_v46 = vpack.c.bf16 %v339_v44, %v338_v45  ;;  %v284_v1 = vadd.f32 %v276_v56, %v227_v61  ;;  %v603_v56 = vld [vmem:[%s1572_s4 + $0x68] sm:$0xff] }
 0x1b4   :  { %v213_v47 = vpop.permute.xlu1 %212  ;;  %1006 = vmatpush3.bf16.msra.mxu0 %v1005_v46 }
 0x1b5   :  { %1007 = vmatprep.subr.bf16.mxu0 %v1114_v8  ;;  %v226_v57 = vmul.f32 %v213_v47, %v178_v52 }
 0x1b9   :  { %v263_v53 = vpop.permute.xlu1 %262 }
 0x1ba   :  { %v275_v55 = vmul.f32 %v839_v50, %v263_v53 }
 0x1bc   :  { %v283_v62 = vadd.f32 %v275_v55, %v226_v57  ;;  %v604_v55 = vld [vmem:[%s1572_s4 + $0x70] sm:$0xf]  ;;  %v605_v57 = vld [vmem:[%s1572_s4 + $0x78] sm:$0xf] }
 0x1be   :  { %v324_v63 = vpop.permute.xlu1 %323  ;;  %v340_v3 = vadd.f32 %v332_v0, %v283_v62 }
 0x1bf   :  { %v333_v2 = vmul.f32 %v848_v60, %v324_v63 }
 0x1c1   :  { %v341_v4 = vadd.f32 %v333_v2, %v284_v1  ;;  %v717_v2 = vld [vmem:[%s1569_s6 + $0x90] sm:$0xff] }
 0x1c3   :  { %v1008_v6 = vpack.c.bf16 %v341_v4, %v340_v3  ;;  %v718_v3 = vld [vmem:[%s1569_s6 + $0x98] sm:$0xff]  ;;  %v719_v4 = vld [vmem:[%s1569_s6 + $0xa0] sm:$0xff] }
 0x1c5   :  { %1010 = vmatpush3.bf16.msk.msra.mxu0 %vm1445_vm5, %v1008_v6  ;;  %v1065_v6 = vpack.c.bf16 %v718_v3, %v717_v2 }
 0x1c7   :  { %1066 = vmatpush1.bf16.msra.mxu1 %v1065_v6 }
 0x1c8   :  { %964 = vmatmul.mubr.msk.f32.vlgmr.msra.gmra.mrb[8].mxu0 %vm347_vm6, %v1454_v7  ;;  %1067 = vmatprep.subr.bf16.mxu1 %v1114_v8 }
 0x1c9   :  { %692 = vmatprep.mubr.f32.mxu0 %v1112_v48 }
 0x1d0   :  { %v543_v9 = vpop.f32.mrb[0].mxu1 }
 0x1d1   :  { %v545_v10 = vpop.f32.mrb[1].mxu1  ;;  %v606_v16 = vmul.f32 %v590_v11, %v543_v9  ;;  %v1068_v9 = vpack.c.bf16 %v720_v5, %v719_v4 }
 0x1d2   :  { %v607_v19 = vmul.f32 %v591_v13, %v545_v10  ;;  %v722_v10 = vld [vmem:[%s1569_s6 + $0xb8] sm:$0xff]  ;;  %v724_v13 = vld [vmem:[%s1569_s6 + $0xc8] sm:$0xff] }
 0x1d3   :  { %1069 = vmatpush1.bf16.msra.mxu1 %v1068_v9 }
 0x1d4   :  { %v549_v15 = vpop.f32.mrb[2].mxu1  ;;  %1070 = vmatprep.subr.bf16.mxu1 %v1114_v8 }
 0x1d5   :  { %v608_v17 = vmul.f32 %v592_v12, %v549_v15  ;;  %v551_v18 = vpop.f32.mrb[3].mxu1  ;;  %v723_v12 = vld [vmem:[%s1569_s6 + $0xc0] sm:$0xff]  ;;  %v725_v15 = vld [vmem:[%s1569_s6 + $0xd0] sm:$0x3] }
 0x1d6   :  { %v609_v20 = vmul.f32 %v593_v14, %v551_v18  ;;  %v1074_v14 = vpack.c.bf16 %v724_v13, %v723_v12 }
 0x1d7   :  { %v1021_v21 = vpack.c.bf16 %v608_v17, %v606_v16  ;;  %v849_v16 = vld [vmem:[%s1568_s2 + $0x1] ss:$0 sm:$0xff] }
 0x1d8   :  { %v1019_v22 = vpack.c.bf16 %v609_v20, %v607_v19 }
 0x1d9   :  { %v555_v23 = vpop.f32.mrb[4].mxu1 }
 0x1da   :  { %v557_v24 = vpop.f32.mrb[5].mxu1  ;;  %1020 = vmatprep.subr.bf16.mxu0 %v1019_v22  ;;  %v610_v30 = vmul.f32 %v594_v25, %v555_v23 }
 0x1db   :  { %1022 = vmatpush1.bf16.msra.mxu0 %v1021_v21  ;;  %v611_v33 = vmul.f32 %v595_v27, %v557_v24  ;;  %v867_v24 = vld [vmem:[%s1568_s2 + $0x2] ss:$0 sm:$0xff] }
 0x1dd   :  { %v561_v29 = vpop.f32.mrb[6].mxu1 }
 0x1de   :  { %v612_v31 = vmul.f32 %v596_v26, %v561_v29  ;;  %v563_v32 = vpop.f32.mrb[7].mxu1 }
 0x1df   :  { %v613_v34 = vmul.f32 %v597_v28, %v563_v32  ;;  %v853_v28 = vld [vmem:[%s1568_s2 + $0x4] ss:$0 sm:$0xff] }
 0x1e0   :  { %v1025_v35 = vpack.c.bf16 %v612_v31, %v610_v30 }
 0x1e1   :  { %v1023_v36 = vpack.c.bf16 %v613_v34, %v611_v33  ;;  %v567_v37 = vpop.f32.mrb[8].mxu1 }
 0x1e2   :  { %v569_v38 = vpop.f32.mrb[9].mxu1  ;;  %v614_v44 = vmul.f32 %v598_v39, %v567_v37 }
 0x1e3   :  { %1024 = vmatprep.subr.bf16.mxu0 %v1023_v36  ;;  %v615_v47 = vmul.f32 %v599_v41, %v569_v38 }
 0x1e4   :  { %1026 = vmatpush1.bf16.msra.mxu0 %v1025_v35 }
 0x1e5   :  { %v573_v43 = vpop.f32.mrb[10].mxu1 }
 0x1e6   :  { %v616_v45 = vmul.f32 %v600_v40, %v573_v43  ;;  %v575_v46 = vpop.f32.mrb[11].mxu1 }
 0x1e7   :  { %v617_v49 = vmul.f32 %v601_v42, %v575_v46 }
 0x1e8   :  { %v1029_v50 = vpack.c.bf16 %v616_v45, %v614_v44 }
 0x1e9   :  { %v1027_v51 = vpack.c.bf16 %v617_v49, %v615_v47  ;;  %v579_v52 = vpop.f32.mrb[12].mxu1 }
 0x1ea   :  { %v581_v53 = vpop.f32.mrb[13].mxu1  ;;  %v618_v59 = vmul.f32 %v602_v54, %v579_v52 }
 0x1eb   :  { %1028 = vmatprep.subr.bf16.mxu0 %v1027_v51  ;;  %v619_v62 = vmul.f32 %v603_v56, %v581_v53 }
 0x1ec   :  { %1030 = vmatpush1.bf16.msra.mxu0 %v1029_v50 }
 0x1ed   :  { %v585_v58 = vpop.f32.mrb[14].mxu1 }
 0x1ee   :  { %v620_v60 = vmul.f32 %v604_v55, %v585_v58  ;;  %v587_v61 = vpop.f32.mrb[15].mxu1 }
 0x1ef   :  { %v621_v63 = vmul.f32 %v605_v57, %v587_v61 }
 0x1f0   :  { %v1034_v0 = vpack.c.bf16 %v620_v60, %v618_v59 }
 0x1f1   :  { %v1031_v1 = vpack.c.bf16 %v621_v63, %v619_v62 }
 0x1f3   :  { %1033 = vmatprep.subr.msk.bf16.mxu0 %vm1445_vm5, %v1031_v1 }
 0x1f4   :  { %1036 = vmatpush1.bf16.msk.msra.mxu0 %vm1445_vm5, %v1034_v0 }
 0x1f7   :  { %866 = vmatmul.mubr.msk.f32.vlgmr.msra.gmra.mrb[10].mxu0 %vm347_vm6, %v1454_v7  ;;  %v721_v7 = vld [vmem:[%s1569_s6 + $0xb0] sm:$0xff] }
 0x1f8   :  { %v1071_v11 = vpack.c.bf16 %v722_v10, %v721_v7 }
 0x1fa   :  { %1072 = vmatpush1.bf16.msra.mxu1 %v1071_v11 }
 0x1fb   :  { %1073 = vmatprep.subr.bf16.mxu1 %v1114_v8  ;;  %v852_v8 = vld [vmem:[%s1568_s2 + $0x3] ss:$0 sm:$0xff] }
 0x1fe   :  { %1075 = vmatpush1.bf16.msra.mxu1 %v1074_v14 }
 0x1ff   :  { %791 = vmatprep.subr.mxu1 %v1112_v48 }
 0x202   :  { %868 = vmatpush1.msk.msra.mxu1 %vm735_vm7, %v725_v15 }
 0x29b   :  { %v421_v17 = vpop.f32.mrb[8].mxu0 }
 0x29c   :  { %v422_v18 = vadd.f32 %v849_v16, %v421_v17  ;;  %v965_v19 = vpop.f32.mrb[9].mxu0 }
 0x29e   :  { %v425_v20 = vmax.f32 %v422_v18, 0.0 }
 0x2a0   :  { %v431_v48 = vmul.f32 %v852_v8, %v425_v20 }
 0x2a2   :  { %v433_v21 = vsel %vm432_vm8, %v431_v48, 0.0 }
 0x2a3   :  { %434 = vadd.xlane.f32.xlu0 %v433_v21 }
 0x2ca   :  { %v694_v22 = vpop.f32.mrb[10].mxu0 }
 0x2cb   :  { %v696_v23 = vpop.f32.mrb[11].mxu0 }
 0x2cc   :  { %869 = vmatprep.mubr.msk.f32.mxu1 %vm731_vm9, %v696_v23 }
 0x2cd   :  { %804 = vmatmul.mubr.f32.vlgmr.msra.gmra.mrb[16].mxu1 %v694_v22 }
 0x330   :  { %v435_v29 = vpop.xlane.xlu0 %434 }
 0x331   :  { %v441_v31 = vadd.f32 %v853_v28, %v435_v29 }
 0x333   :  { %1104 = vtanh.f32 %v441_v31 }
 0x33d   :  { %v1105_v32 = vpop.eup %1104 }
 0x3a0   :  { %v805_v25 = vpop.f32.mrb[16].mxu1 }
 0x3a1   :  { %v806_v26 = vadd.f32 %v867_v24, %v805_v25  ;;  %v807_v27 = vpop.f32.mrb[17].mxu1 }
 0x3a3   :  { %v810_v30 = vsel %vm809_vm10, %v806_v26, -inf }
 0x3a4   :  { %811 = vmax.xlane.f32.xlu1 %v810_v30 }
 0x3b5   :  { %823 = vrot.lane.b32.xlu1 %v1105_v32, %s1117_s17 }
 0x431   :  { %v812_v33 = vpop.xlane.xlu1 %811 }
 0x432   :  { %v813_v34 = vsub.f32 %v806_v26, %v812_v33 }
 0x434   :  { %v814_v35 = vmul.f32 1.442695, %v813_v34 }
 0x435   :  { %v824_v41 = vpop.permute.xlu1 %823 }
 0x436   :  { %1106 = vpow2.f32 %v814_v35 }
 0x440   :  { %v1107_v36 = vpop.eup %1106 }
 0x441   :  { %v816_v37 = vsel %vm809_vm10, %v1107_v36, 0.0 }
 0x442   :  { %817 = vadd.xlane.f32.xlu0 %v816_v37 }
 0x4cf   :  { %v818_v38 = vpop.xlane.xlu0 %817 }
 0x4d0   :  { %1108 = vrcp.f32 %v818_v38 }
 0x4da   :  { %v1109_v39 = vpop.eup %1108 }
 0x4db   :  { %v820_v40 = vmul.f32 %v1109_v39, %v1107_v36 }
 0x4dd   :  { %821 = vst.msk [vmem:[%s1573_s8] sm:$0x3] %vm809_vm10, %v820_v40 }
 0x4de   :  { %827 = vst.msk [vmem:[%s1573_s8] sm:$0x3] %vm826_vm11, %v824_v41 }

</bundles_post_ra>
